<compile_context>
chip_gen: v6e
topology: v6e:2x2x1
jax: 0.10.0
libtpu: 0.0.40
codegen_flags: <defaults>
</compile_context>

<pallas_src>
import jax
import jax.numpy as jnp
from jax.experimental import pallas as pl
from jax.experimental.pallas import tpu as pltpu


def _round_up(x: int, m: int) -> int:
    return ((x + m - 1) // m) * m


def _cdiv(a: int, b: int) -> int:
    return (a + b - 1) // b


# ----------------------------------------------------------------------------
# Kernels
# ----------------------------------------------------------------------------

def mlp_kernel_resident(x_ref, w1_ref, b1_ref, w2_ref, b2_ref, o_ref):
    # x_ref: (tm, Ep)  w1_ref: (Ep, Fp)  b1_ref: (1, Fp)
    # w2_ref: (Fp, Ep) b2_ref: (1, Ep)   o_ref: (tm, Ep)
    x = x_ref[...]
    h = jnp.dot(x.astype(w1_ref.dtype), w1_ref[...],
                preferred_element_type=jnp.float32)
    h = jnp.maximum(h + b1_ref[...].astype(jnp.float32), 0.0)          # ReLU
    y = jnp.dot(h.astype(w2_ref.dtype), w2_ref[...],
                preferred_element_type=jnp.float32)
    # residual + output bias in f32, then cast (dropout = identity in eval)
    o_ref[...] = (x.astype(jnp.float32) + y
                  + b2_ref[...].astype(jnp.float32)).astype(o_ref.dtype)


def mlp_kernel_chunked(x_ref, w1_ref, b1_ref, w2_ref, b2_ref, o_ref, acc_ref):
    # Hidden dim chunked along grid axis 1; f32 accumulator across chunks.
    f = pl.program_id(1)
    last = pl.num_programs(1) - 1

    x = x_ref[...]
    h = jnp.dot(x.astype(w1_ref.dtype), w1_ref[...],
                preferred_element_type=jnp.float32)
    h = jnp.maximum(h + b1_ref[...].astype(jnp.float32), 0.0)          # ReLU
    contrib = jnp.dot(h.astype(w2_ref.dtype), w2_ref[...],
                      preferred_element_type=jnp.float32)

    @pl.when(f == 0)
    def _():
        # Fold residual + output bias into the first chunk: no zero-fill pass,
        # no re-read of x in the epilogue.
        acc_ref[...] = contrib + x.astype(jnp.float32) + b2_ref[...].astype(jnp.float32)

    @pl.when(f > 0)
    def _():
        acc_ref[...] += contrib

    @pl.when(f == last)
    def _():
        o_ref[...] = acc_ref[...].astype(o_ref.dtype)


# ----------------------------------------------------------------------------
# Tiling / VMEM configuration
# ----------------------------------------------------------------------------

def _vmem_budget_bytes() -> int:
    """~80% of per-core VMEM: ~51 MiB on v7x (64 MiB), ~102 MiB on v5e/v6e (128 MiB)."""
    cap = 64 * 1024 * 1024  # conservative default = v7x per-TC VMEM
    try:
        info = pltpu.get_tpu_info()
        cap = int(getattr(info, "vmem_capacity_bytes", cap))
    except Exception:
        pass
    return int(cap * 0.8)


def _row_tile_candidates(M_al: int):
    """Row-tile sizes to try, largest (best weight reuse) first."""
    if M_al <= 512:
        # Small problem: one exact tile, no padded dead rows.
        cands = [M_al]
    else:
        # Large problem: big 256-aligned tiles, but keep >= 2 row tiles so the
        # 'parallel' axis can shard across v7x's two TensorCores.
        n_tiles = max(2, _cdiv(M_al, 1024))
        cands = [_round_up(_cdiv(M_al, n_tiles), 256)]
    t = cands[-1]
    while t > 128:  # progressively smaller fallbacks if VMEM is tight
        t = max(128, _round_up(t // 2, 128))
        cands.append(t)
    return cands


def _choose_config(M, E, F, isz, wsz, budget):
    """Returns (tm, tf, weights_resident)."""
    E_pad = _round_up(E, 128)
    F_pad = _round_up(F, 128)
    M_al = _round_up(M, 8)

    def fits(tm, tf, resident):
        b = 4 * tm * E_pad * isz                 # x + out tiles, double-buffered
        b += tm * tf * (4 + wsz)                 # h intermediate (f32) + MXU-dtype copy
        b += tm * E_pad * 4                      # y / contrib in f32
        if resident:
            b += 2 * (2 * E_pad * F_pad + F_pad + E_pad) * wsz   # whole weights (2 bufs)
        else:
            b += 2 * (2 * E_pad * tf + tf + E_pad) * wsz         # weight chunks (2 bufs)
            b += tm * E_pad * 4                                  # f32 accumulator scratch
        return b <= budget

    tm_cands = _row_tile_candidates(M_al)

    # Preferred: full W1/W2 VMEM-resident -> no F axis, weights DMA'd once.
    for tm in tm_cands:
        if fits(tm, F_pad, True):
            return tm, F_pad, True

    # Fallback: chunk the hidden dim with an f32 accumulator across chunks.
    for tm in tm_cands:
        for tf in (2048, 1024, 512, 256, 128):
            if tf <= F_pad and fits(tm, tf, False):
                return tm, tf, False

    # Last resort (pathological shapes): smallest tiles.
    return tm_cands[-1], 128, False


# ----------------------------------------------------------------------------
# Wrapper
# ----------------------------------------------------------------------------

def mlp_forward(xs, w1, b1, w2, b2, *, param_dtype=None, tile_vmem_budget=None):
    """xs: [B, S, E]; w1: [E, F]; b1: [F]; w2: [F, E]; b2: [E] -> [B, S, E].

    param_dtype: optional dtype (e.g. jnp.bfloat16) for parameters / MXU inputs.
    tile_vmem_budget: override the VMEM budget used for tile selection (testing).
    """
    B, S, E = xs.shape
    F = w1.shape[1]
    M = B * S

    w_dtype = jnp.dtype(param_dtype) if param_dtype is not None else jnp.dtype(w1.dtype)
    isz = jnp.dtype(xs.dtype).itemsize
    wsz = w_dtype.itemsize

    hw_budget = _vmem_budget_bytes()
    tile_budget = hw_budget if tile_vmem_budget is None else int(tile_vmem_budget)
    tm, tf, resident = _choose_config(M, E, F, isz, wsz, tile_budget)

    E_pad = _round_up(E, 128)
    F_pad = _round_up(_round_up(F, 128), tf)
    M_pad = _round_up(_round_up(M, 8), tm)

    def maybe_pad(a, shape):
        pads = tuple((0, t - s) for s, t in zip(a.shape, shape))
        return a if all(p == (0, 0) for p in pads) else jnp.pad(a, pads)

    x2d = maybe_pad(xs.reshape(M, E), (M_pad, E_pad))
    # NOTE: parameters are static in a real model -> pre-pad/cast them once
    # outside the step function; padding is skipped here when already aligned.
    w1p = maybe_pad(w1.astype(w_dtype), (E_pad, F_pad))
    b1p = maybe_pad(b1.astype(w_dtype).reshape(1, F), (1, F_pad))
    w2p = maybe_pad(w2.astype(w_dtype), (F_pad, E_pad))
    b2p = maybe_pad(b2.astype(w_dtype).reshape(1, E), (1, E_pad))

    n_m = M_pad // tm

    if resident:
        grid = (n_m,)
        in_specs = [
            pl.BlockSpec((tm, E_pad), lambda i: (i, 0)),       # x rows tile
            pl.BlockSpec((E_pad, F_pad), lambda i: (0, 0)),    # W1 (resident)
            pl.BlockSpec((1, F_pad), lambda i: (0, 0)),        # b1 (resident)
            pl.BlockSpec((F_pad, E_pad), lambda i: (0, 0)),    # W2 (resident)
            pl.BlockSpec((1, E_pad), lambda i: (0, 0)),        # b2 (resident)
        ]
        out_specs = pl.BlockSpec((tm, E_pad), lambda i: (i, 0))
        scratch_shapes = []
        kernel = mlp_kernel_resident
        dims = ("parallel",)
        weight_reads = 1                      # constant block index -> fetched once
    else:
        n_f = F_pad // tf
        grid = (n_m, n_f)                     # M outer "parallel", F inner "arbitrary"
        in_specs = [
            pl.BlockSpec((tm, E_pad), lambda i, f: (i, 0)),    # x rows tile
            pl.BlockSpec((E_pad, tf), lambda i, f: (0, f)),    # W1 F-chunk
            pl.BlockSpec((1, tf), lambda i, f: (0, f)),        # b1 F-chunk
            pl.BlockSpec((tf, E_pad), lambda i, f: (f, 0)),    # W2 F-chunk
            pl.BlockSpec((1, E_pad), lambda i, f: (0, 0)),     # b2
        ]
        out_specs = pl.BlockSpec((tm, E_pad), lambda i, f: (i, 0))
        scratch_shapes = [pltpu.VMEM((tm, E_pad), jnp.float32)]
        kernel = mlp_kernel_chunked
        dims = ("parallel", "arbitrary")
        weight_reads = n_m                    # chunks re-streamed once per row tile

    w_bytes = (w1p.size + w2p.size + b1p.size + b2p.size) * wsz
    cost = pl.CostEstimate(
        flops=4 * M_pad * E_pad * F_pad,                       # two matmuls
        transcendentals=0,
        bytes_accessed=(x2d.size * isz + M_pad * E_pad * isz
                        + weight_reads * w_bytes),
    )

    out2d = pl.pallas_call(
        kernel,
        out_shape=jax.ShapeDtypeStruct((M_pad, E_pad), xs.dtype),
        grid_spec=pltpu.PrefetchScalarGridSpec(
            num_scalar_prefetch=0,
            grid=grid,
            in_specs=in_specs,
            out_specs=out_specs,
            scratch_shapes=scratch_shapes,
        ),
        compiler_params=pltpu.CompilerParams(
            dimension_semantics=dims,
            vmem_limit_bytes=int(hw_budget),
        ),
        cost_estimate=cost,
    )(x2d, w1p, b1p, w2p, b2p)

    return out2d[:M, :E].reshape(B, S, E)


# ----------------------------------------------------------------------------
# Reference + tests
# ----------------------------------------------------------------------------

def mlp_reference(xs, w1, b1, w2, b2):
    # plain-JAX reference of the same math (eval-mode dropout = identity)
    h = jnp.maximum(jnp.einsum("bse,ef->bsf", xs, w1) + b1, 0.0)
    y = jnp.einsum("bsf,fe->bse", h, w2) + b2
    return xs + y


def _run_case(key, B, S, E, F, atol=1e-5, rtol=1e-5, **kwargs):
    kx, k1, k2, k3, k4 = jax.random.split(key, 5)
    xs = jax.random.normal(kx, (B, S, E), dtype=jnp.float32)
    # deterministic synthetic parameters (Linear1: E->F, Linear2: F->E)
    w1 = jax.random.normal(k1, (E, F), dtype=jnp.float32) * 0.02
    b1 = jax.random.normal(k2, (F,), dtype=jnp.float32) * 0.02
    w2 = jax.random.normal(k3, (F, E), dtype=jnp.float32) * 0.02
    b2 = jax.random.normal(k4, (E,), dtype=jnp.float32) * 0.02
    # TODO(synk): t5_layer_norm weight (ones(E)) exists in the module but its
    # output is unused in forward(), so it does not affect the kernel result.

    out = jax.block_until_ready(mlp_forward(xs, w1, b1, w2, b2, **kwargs))
    ref = mlp_reference(xs, w1, b1, w2, b2)
    assert out.shape == (B, S, E) and out.dtype == xs.dtype
    assert jnp.allclose(out, ref, atol=atol, rtol=rtol), (
        float(jnp.max(jnp.abs(out - ref))))


if __name__ == "__main__":
    key = jax.random.PRNGKey(0)
    k_a, k_b = jax.random.split(key)

    # Spec-sized toy case (embed_dim=32 -> 128 lanes, ff_dim=64 -> 128):
    # takes the preferred resident-weights path, single row tile.
    _run_case(k_a, B=2, S=8, E=32, F=64)

    # Larger case forced onto the chunked-accumulator fallback (artificially
    # tiny tiling budget) to exercise multiple M tiles and multiple F chunks.
    _run_case(k_b, B=4, S=72, E=160, F=320,
              tile_vmem_budget=int(2.5 * 1024 * 1024))

    # Same case on the resident path with bf16 parameters (perf-review
    # recommendation); looser tolerance vs the f32 reference numerics.
    _run_case(k_b, B=4, S=72, E=160, F=320,
              param_dtype=jnp.bfloat16, atol=5e-2, rtol=5e-2)

    print("KERNEL_OK")
</pallas_src>

<mosaic_0001>
module attributes {stable_mosaic.version = 11 : i64} {
  func.func @mlp_kernel_resident(%arg0: i32, %arg1: memref<16x128xf32, #tpu.memory_space<vmem>>, %arg2: memref<128x128xf32, #tpu.memory_space<vmem>>, %arg3: memref<1x128xf32, #tpu.memory_space<vmem>>, %arg4: memref<128x128xf32, #tpu.memory_space<vmem>>, %arg5: memref<1x128xf32, #tpu.memory_space<vmem>>, %arg6: memref<16x128xf32, #tpu.memory_space<vmem>>) attributes {dimension_semantics = [#tpu.dimension_semantics<parallel>], iteration_bounds = array<i64: 1>, scalar_prefetch = 0 : i64, scratch_operands = 0 : i64, tpu.core_type = #tpu.core_type<tc>, window_params = [{transform_indices = @transform_0, window_bounds = array<i64: 16, 128>}, {pipeline_mode = #tpu.pipeline_mode<synchronous>, transform_indices = @transform_1, window_bounds = array<i64: 128, 128>}, {pipeline_mode = #tpu.pipeline_mode<synchronous>, transform_indices = @transform_2, window_bounds = array<i64: 1, 128>}, {pipeline_mode = #tpu.pipeline_mode<synchronous>, transform_indices = @transform_3, window_bounds = array<i64: 128, 128>}, {pipeline_mode = #tpu.pipeline_mode<synchronous>, transform_indices = @transform_4, window_bounds = array<i64: 1, 128>}, {transform_indices = @transform_5, window_bounds = array<i64: 16, 128>}]} {
    %c0 = arith.constant 0 : index
    %c0_0 = arith.constant 0 : index
    %0 = vector.load %arg1[%c0, %c0_0] : memref<16x128xf32, #tpu.memory_space<vmem>>, vector<16x128xf32>
    %c0_1 = arith.constant 0 : index
    %c0_2 = arith.constant 0 : index
    %1 = vector.load %arg2[%c0_1, %c0_2] : memref<128x128xf32, #tpu.memory_space<vmem>>, vector<128x128xf32>
    %cst = arith.constant dense<0.000000e+00> : vector<16x128xf32>
    %2 = tpu.matmul %0, %1, %cst {dimension_numbers = #tpu.dot_dimension_numbers<[1], [0], [0], [1], [0, 0, 1, 1], [], []>} : vector<16x128xf32>, vector<128x128xf32>, vector<16x128xf32> -> vector<16x128xf32>
    %c0_3 = arith.constant 0 : index
    %c0_4 = arith.constant 0 : index
    %3 = vector.load %arg3[%c0_3, %c0_4] : memref<1x128xf32, #tpu.memory_space<vmem>>, vector<1x128xf32>
    %4 = vector.broadcast %3 : vector<1x128xf32> to vector<16x128xf32>
    %5 = arith.addf %2, %4 : vector<16x128xf32>
    %cst_5 = arith.constant 0.000000e+00 : f32
    %6 = vector.broadcast %cst_5 : f32 to vector<16x128xf32>
    %7 = arith.maximumf %5, %6 : vector<16x128xf32>
    %c0_6 = arith.constant 0 : index
    %c0_7 = arith.constant 0 : index
    %8 = vector.load %arg4[%c0_6, %c0_7] : memref<128x128xf32, #tpu.memory_space<vmem>>, vector<128x128xf32>
    %cst_8 = arith.constant dense<0.000000e+00> : vector<16x128xf32>
    %9 = tpu.matmul %7, %8, %cst_8 {dimension_numbers = #tpu.dot_dimension_numbers<[1], [0], [0], [1], [0, 0, 1, 1], [], []>} : vector<16x128xf32>, vector<128x128xf32>, vector<16x128xf32> -> vector<16x128xf32>
    %10 = arith.addf %0, %9 : vector<16x128xf32>
    %c0_9 = arith.constant 0 : index
    %c0_10 = arith.constant 0 : index
    %11 = vector.load %arg5[%c0_9, %c0_10] : memref<1x128xf32, #tpu.memory_space<vmem>>, vector<1x128xf32>
    %12 = vector.broadcast %11 : vector<1x128xf32> to vector<16x128xf32>
    %13 = arith.addf %10, %12 : vector<16x128xf32>
    %c0_11 = arith.constant 0 : index
    %c0_12 = arith.constant 0 : index
    %14 = vector.load %arg6[%c0_11, %c0_12] : memref<16x128xf32, #tpu.memory_space<vmem>>, vector<16x128xf32>
    tpu.vector_store %arg6[%c0_11, %c0_12], %13 {strides = array<i32>} : memref<16x128xf32, #tpu.memory_space<vmem>>, vector<16x128xf32>,
    return
  }
  func.func @transform_0(%arg0: i32) -> (i32, i32) {
    %c0_i32 = arith.constant 0 : i32
    %c0_i32_0 = arith.constant 0 : i32
    return %arg0, %c0_i32 : i32, i32
  }
  func.func @transform_1(%arg0: i32) -> (i32, i32) {
    %c0_i32 = arith.constant 0 : i32
    %c0_i32_0 = arith.constant 0 : i32
    %c0_i32_1 = arith.constant 0 : i32
    return %c0_i32, %c0_i32_0 : i32, i32
  }
  func.func @transform_2(%arg0: i32) -> (i32, i32) {
    %c0_i32 = arith.constant 0 : i32
    %c0_i32_0 = arith.constant 0 : i32
    %c0_i32_1 = arith.constant 0 : i32
    return %c0_i32, %c0_i32_0 : i32, i32
  }
  func.func @transform_3(%arg0: i32) -> (i32, i32) {
    %c0_i32 = arith.constant 0 : i32
    %c0_i32_0 = arith.constant 0 : i32
    %c0_i32_1 = arith.constant 0 : i32
    return %c0_i32, %c0_i32_0 : i32, i32
  }
  func.func @transform_4(%arg0: i32) -> (i32, i32) {
    %c0_i32 = arith.constant 0 : i32
    %c0_i32_0 = arith.constant 0 : i32
    %c0_i32_1 = arith.constant 0 : i32
    return %c0_i32, %c0_i32_0 : i32, i32
  }
  func.func @transform_5(%arg0: i32) -> (i32, i32) {
    %c0_i32 = arith.constant 0 : i32
    %c0_i32_0 = arith.constant 0 : i32
    return %arg0, %c0_i32 : i32, i32
  }
}

</mosaic_0001>

<bundles_post_ra>
// kernel: tpu_custom_call.1
= control target key start
LH: loop header
LB: loop body
LE: loop exit
PB: predicated region body
PF: predicated region fallthrough
CT: control target
= control target key end

     0   :  { %10 = vsyncpa [#allocation3], 0  ;;  %s556_s0 = inlined_call_operand.hbm [shape: f32[16,128], index: 0, kind: input, shape index: {}]   ;;  %s557_s1 = inlined_call_operand.hbm [shape: f32[128,128], index: 1, kind: input, shape index: {}]   ;;  %s558_s2 = inlined_call_operand.vmem [shape: f32[1,128], index: 2, kind: input, shape index: {}]   ;;  %s559_s3 = inlined_call_operand.hbm [shape: f32[128,128], index: 3, kind: input, shape index: {}]   ;;  %s560_s4 = inlined_call_operand.vmem [shape: f32[1,128], index: 4, kind: input, shape index: {}]   ;;  %s561_s5 = inlined_call_operand.hbm [shape: f32[16,128], index: 5, kind: output, shape index: {}]  }
   0x1   :  { %11 = vsyncpa [#allocation6], 0 }
   0x2   :  { %12 = vsyncpa [#allocation4], 0  ;;  %s486_s18 = smov [#allocation5]   ;;  %s487_s20 = smov [#allocation2]  }
   0x3   :  { %s30_s19 = sshll.u32 %s486_s18, 4  ;;  %s18_s21 = sshll.u32 %s487_s20, 4  ;;  %s31_s19 = int_to_ptr.vmem [resolvable:$true] %s30_s19  ;;  %s19_s21 = int_to_ptr.vmem [resolvable:$true] %s18_s21 }
   0x4   :  { %s408_s22 = scalar_lea.vmem %s31_s19, 2048  ;;  %p413_p1 = scmp.lt.s32.totalorder %s31_s19, %s31_s19 }
   0x5   :  { %p409_p0 = scmp.ne.s32.totalorder %s31_s19, %s408_s22  ;;  %p414_p2 = scmp.lt.s32.totalorder %s408_s22, %s408_s22 }
   0x7   :  { %p415_p3 = por %p414_p2, %p413_p1 }
   0x9   :  { %p416_p4 = pnand %p415_p3, %p409_p0 }
   0xb   :  { %419 = shalt.err (!%p416_p4)
}
   0xc   :  { %s488_s23 = smov 128   ;;  %s489_s24 = smov 8  }
   0xd   :  { %36 = dma.hbm_to_vmem [thread:$0]  %s557_s1, 2048, %s31_s19, [#allocation6], %s488_s23, %s488_s23, %s489_s24  }
   0xe   :  { %s428_s27 = scalar_lea.vmem %s19_s21, 256  ;;  %p433_p6 = scmp.lt.s32.totalorder %s19_s21, %s19_s21 }
   0xf   :  { %p429_p5 = scmp.ne.s32.totalorder %s19_s21, %s428_s27  ;;  %p434_p7 = scmp.lt.s32.totalorder %s428_s27, %s428_s27 }
  0x11   :  { %p435_p8 = por %p434_p7, %p433_p6 }
  0x13   :  { %p436_p9 = pnand %p435_p8, %p429_p5 }
  0x15   :  { %439 = shalt.err (!%p436_p9)
}
  0x16   :  { %24 = dma.hbm_to_vmem [thread:$0]  %s556_s0, 256, %s19_s21, [#allocation3], %s488_s23, %s488_s23, %s489_s24  }
  0x17   :  { %s490_s30 = smov [#allocation7]  }
  0x18   :  { %s44_s6 = sshll.u32 %s490_s30, 4  ;;  %s45_s6 = int_to_ptr.vmem [resolvable:$true] %s44_s6 }
  0x19   :  { %s448_s7 = scalar_lea.vmem %s45_s6, 2048  ;;  %p453_p11 = scmp.lt.s32.totalorder %s45_s6, %s45_s6 }
  0x1a   :  { %p449_p10 = scmp.ne.s32.totalorder %s45_s6, %s448_s7  ;;  %p454_p12 = scmp.lt.s32.totalorder %s448_s7, %s448_s7 }
  0x1c   :  { %p455_p13 = por %p454_p12, %p453_p11 }
  0x1e   :  { %p456_p0 = pnand %p455_p13, %p449_p10 }
  0x20   :  { %459 = shalt.err (!%p456_p0)
}
  0x21   :  { %50 = dma.hbm_to_vmem [thread:$0]  %s559_s3, 2048, %s45_s6, [#allocation6], %s488_s23, %s488_s23, %s489_s24  }
  0x22   :  { %480 = dma.done.wait [#allocation3], 256  }
  0x23   :  { %481 = vsyncadd [#allocation3], 4294967040 }
  0x24   :  { %482 = dma.done.wait [#allocation6], 4096  }
  0x25   :  { %483 = vsyncadd [#allocation6], 4294963200  ;;  %v79_v0 = vld [vmem:[#allocation5 + $0x78] sm:$0xff]  ;;  %v78_v1 = vld [vmem:[#allocation5 + $0x70] sm:$0xff]  ;;  %s491_s11 = smov [#allocation8]  }
  0x26   :  { %324 = vmatprep.subr.mxu0 %v79_v0  ;;  %v77_v2 = vld [vmem:[#allocation5 + $0x68] sm:$0xff]  ;;  %v76_v3 = vld [vmem:[#allocation5 + $0x60] sm:$0xff]  ;;  %v540_v4 = vld [vmem:[#allocation2] sm:$0xff]  ;;  %s273_s12 = sshll.u32 %s491_s11, 4  ;;  %s274_s12 = int_to_ptr.vmem [resolvable:$true] %s273_s12 }
  0x27   :  { %325 = vmatpush3.msra.mxu0 %v79_v0  ;;  %v75_v5 = vld [vmem:[#allocation5 + $0x58] sm:$0xff]  ;;  %356 = vmatprep.mubr.f32.mxu0 %v540_v4  ;;  %v178_v7 = vld [vmem:[#allocation7 + $0x70] sm:$0xff]  ;;  %v177_v9 = vld [vmem:[#allocation7 + $0x68] sm:$0xff]  ;;  %p465_p2 = scmp.lt.s32.totalorder %s274_s12, %s274_s12 }
  0x28   :  { %326 = vmatprep.subr.mxu0 %v78_v1  ;;  %v179_v6 = vld [vmem:[#allocation7 + $0x78] sm:$0xff]  ;;  %v74_v8 = vld [vmem:[#allocation5 + $0x50] sm:$0xff]  ;;  %v73_v10 = vld [vmem:[#allocation5 + $0x48] sm:$0xff] }
  0x29   :  { %327 = vmatpush3.msra.mxu0 %v78_v1  ;;  %359 = vmatprep.subr.mxu1 %v179_v6  ;;  %v176_v11 = vld [vmem:[#allocation7 + $0x60] sm:$0xff]  ;;  %v175_v13 = vld [vmem:[#allocation7 + $0x58] sm:$0xff]  ;;  %v174_v15 = vld [vmem:[#allocation7 + $0x50] sm:$0xff] }
  0x2a   :  { %328 = vmatprep.subr.mxu0 %v77_v2  ;;  %360 = vmatpush3.msra.mxu1 %v179_v6  ;;  %v72_v12 = vld [vmem:[#allocation5 + $0x40] sm:$0xff]  ;;  %v71_v14 = vld [vmem:[#allocation5 + $0x38] sm:$0xff]  ;;  %v70_v16 = vld [vmem:[#allocation5 + $0x30] sm:$0xff] }
  0x2b   :  { %329 = vmatpush3.msra.mxu0 %v77_v2  ;;  %361 = vmatprep.subr.mxu1 %v178_v7  ;;  %v173_v17 = vld [vmem:[#allocation7 + $0x48] sm:$0xff]  ;;  %v172_v19 = vld [vmem:[#allocation7 + $0x40] sm:$0xff]  ;;  %v171_v21 = vld [vmem:[#allocation7 + $0x38] sm:$0xff] }
  0x2c   :  { %330 = vmatprep.subr.mxu0 %v76_v3  ;;  %362 = vmatpush3.msra.mxu1 %v178_v7  ;;  %v69_v18 = vld [vmem:[#allocation5 + $0x28] sm:$0xff]  ;;  %v68_v20 = vld [vmem:[#allocation5 + $0x20] sm:$0xff]  ;;  %v67_v22 = vld [vmem:[#allocation5 + $0x18] sm:$0xff] }
  0x2d   :  { %331 = vmatpush3.msra.mxu0 %v76_v3  ;;  %363 = vmatprep.subr.mxu1 %v177_v9  ;;  %v170_v23 = vld [vmem:[#allocation7 + $0x30] sm:$0xff]  ;;  %v169_v25 = vld [vmem:[#allocation7 + $0x28] sm:$0xff]  ;;  %v168_v27 = vld [vmem:[#allocation7 + $0x20] sm:$0xff] }
  0x2e   :  { %332 = vmatprep.subr.mxu0 %v75_v5  ;;  %364 = vmatpush3.msra.mxu1 %v177_v9  ;;  %v66_v24 = vld [vmem:[#allocation5 + $0x10] sm:$0xff]  ;;  %v65_v26 = vld [vmem:[#allocation5 + $0x8] sm:$0xff]  ;;  %v64_v28 = vld [vmem:[#allocation5] sm:$0xff] }
  0x2f   :  { %333 = vmatpush3.msra.mxu0 %v75_v5  ;;  %365 = vmatprep.subr.mxu1 %v176_v11  ;;  %v63_v29 = vld [vmem:[#allocation2 + $0x8] sm:$0xff]  ;;  %v166_v31 = vld [vmem:[#allocation7 + $0x10] sm:$0xff]  ;;  %v165_v32 = vld [vmem:[#allocation7 + $0x8] sm:$0xff] }
  0x30   :  { %334 = vmatprep.subr.mxu0 %v74_v8  ;;  %366 = vmatpush3.msra.mxu1 %v176_v11  ;;  %v167_v30 = vld [vmem:[#allocation7 + $0x18] sm:$0xff]  ;;  %v164_v33 = vld [vmem:[#allocation7] sm:$0xff]  ;;  %v286_v34 = vld [vmem:[%s558_s2] ss:$0 sm:$0xff]  ;;  %s460_s2 = scalar_lea.vmem %s274_s12, 256 }
  0x31   :  { %335 = vmatpush3.msra.mxu0 %v74_v8  ;;  %367 = vmatprep.subr.mxu1 %v175_v13  ;;  %v287_v42 = vld [vmem:[%s560_s4] ss:$0 sm:$0xff]  ;;  %p461_p1 = scmp.ne.s32.totalorder %s274_s12, %s460_s2  ;;  %p466_p3 = scmp.lt.s32.totalorder %s460_s2, %s460_s2 }
  0x32   :  { %336 = vmatprep.subr.mxu0 %v73_v10  ;;  %368 = vmatpush3.msra.mxu1 %v175_v13 }
  0x33   :  { %337 = vmatpush3.msra.mxu0 %v73_v10  ;;  %369 = vmatprep.subr.mxu1 %v174_v15  ;;  %p467_p4 = por %p466_p3, %p465_p2 }
  0x34   :  { %338 = vmatprep.subr.mxu0 %v72_v12  ;;  %370 = vmatpush3.msra.mxu1 %v174_v15 }
  0x35   :  { %339 = vmatpush3.msra.mxu0 %v72_v12  ;;  %371 = vmatprep.subr.mxu1 %v173_v17  ;;  %p468_p5 = pnand %p467_p4, %p461_p1 }
  0x36   :  { %340 = vmatprep.subr.mxu0 %v71_v14  ;;  %372 = vmatpush3.msra.mxu1 %v173_v17 }
  0x37   :  { %341 = vmatpush3.msra.mxu0 %v71_v14  ;;  %373 = vmatprep.subr.mxu1 %v172_v19 }
  0x38   :  { %342 = vmatprep.subr.mxu0 %v70_v16  ;;  %374 = vmatpush3.msra.mxu1 %v172_v19 }
  0x39   :  { %343 = vmatpush3.msra.mxu0 %v70_v16  ;;  %375 = vmatprep.subr.mxu1 %v171_v21 }
  0x3a   :  { %344 = vmatprep.subr.mxu0 %v69_v18  ;;  %376 = vmatpush3.msra.mxu1 %v171_v21 }
  0x3b   :  { %345 = vmatpush3.msra.mxu0 %v69_v18  ;;  %377 = vmatprep.subr.mxu1 %v170_v23 }
  0x3c   :  { %346 = vmatprep.subr.mxu0 %v68_v20  ;;  %378 = vmatpush3.msra.mxu1 %v170_v23 }
  0x3d   :  { %347 = vmatpush3.msra.mxu0 %v68_v20  ;;  %379 = vmatprep.subr.mxu1 %v169_v25 }
  0x3e   :  { %348 = vmatprep.subr.mxu0 %v67_v22  ;;  %380 = vmatpush3.msra.mxu1 %v169_v25 }
  0x3f   :  { %349 = vmatpush3.msra.mxu0 %v67_v22  ;;  %381 = vmatprep.subr.mxu1 %v168_v27 }
  0x40   :  { %350 = vmatprep.subr.mxu0 %v66_v24  ;;  %382 = vmatpush3.msra.mxu1 %v168_v27 }
  0x41   :  { %351 = vmatpush3.msra.mxu0 %v66_v24  ;;  %383 = vmatprep.subr.mxu1 %v167_v30 }
  0x42   :  { %352 = vmatprep.subr.mxu0 %v65_v26  ;;  %384 = vmatpush3.msra.mxu1 %v167_v30 }
  0x43   :  { %353 = vmatpush3.msra.mxu0 %v65_v26  ;;  %385 = vmatprep.subr.mxu1 %v166_v31 }
  0x44   :  { %354 = vmatprep.subr.mxu0 %v64_v28  ;;  %386 = vmatpush3.msra.mxu1 %v166_v31 }
  0x45   :  { %355 = vmatpush3.msra.mxu0 %v64_v28  ;;  %387 = vmatprep.subr.mxu1 %v165_v32 }
  0x46   :  { %357 = vmatmul.mubr.f32.vlgmr.msra.gmra.mxu0 %v63_v29  ;;  %388 = vmatpush3.msra.mxu1 %v165_v32 }
  0x47   :  { %389 = vmatprep.subr.mxu1 %v164_v33 }
  0x48   :  { %390 = vmatpush3.msra.mxu1 %v164_v33 }
 0x106   :  { %v358_v35 = vpop.f32.mrf.mxu0 }
 0x107   :  { %v159_v36 = vadd.f32 %v358_v35, %v286_v34 }
 0x108   :  { %v153_v37 = vpop.f32.mrf.mxu0 }
 0x109   :  { %v154_v38 = vadd.f32 %v286_v34, %v153_v37  ;;  %v163_v40 = vmax.f32 %v159_v36, 0.0 }
 0x10b   :  { %v162_v39 = vmax.f32 %v154_v38, 0.0 }
 0x10d   :  { %391 = vmatprep.mubr.f32.mxu1 %v162_v39 }
 0x10e   :  { %392 = vmatmul.mubr.f32.vlgmr.msra.gmra.mxu1 %v163_v40 }
 0x1ce   :  { %v393_v41 = vpop.f32.mrf.mxu1 }
 0x1cf   :  { %v256_v43 = vadd.f32 %v393_v41, %v63_v29 }
 0x1d0   :  { %v246_v44 = vpop.f32.mrf.mxu1 }
 0x1d1   :  { %v265_v45 = vadd.f32 %v287_v42, %v256_v43  ;;  %v255_v46 = vadd.f32 %v246_v44, %v540_v4 }
 0x1d3   :  { %267 = vst [vmem:[#allocation8 + $0x8] sm:$0xff] %v265_v45  ;;  %v264_v47 = vadd.f32 %v287_v42, %v255_v46 }
 0x1d5   :  { %266 = vst [vmem:[#allocation8] sm:$0xff] %v264_v47 }
 0x1d6   :  { %471 = shalt.err (!%p468_p5)
}
 0x1d7   :  { %279 = dma.vmem_to_hbm [thread:$0]  %s274_s12, 256, %s561_s5, [#allocation4], %s488_s23, %s488_s23, %s489_s24  }
 0x1d8   :  { %484 = dma.done.wait [#allocation4], 256  }
 0x1d9   :  { %485 = vsyncadd [#allocation4], 4294967040 }
 0x1da   :  { %283 = vsyncpa [#allocation3], 1 }
 0x1db   :  { %284 = vsyncpa [#allocation6], 1 }
 0x1dc   :  { %285 = vsyncpa [#allocation4], 1 }

</bundles_post_ra>
